<compile_context>
chip_gen: v7x
topology: tpu7x:2x2x1
jax: 0.10.0
libtpu: 0.0.40
codegen_flags: <defaults>
</compile_context>

<pallas_src>
import functools

import jax
import jax.numpy as jnp
import numpy as np
from jax.experimental import pallas as pl
from jax.experimental.pallas import tpu as pltpu


# ---------------------------------------------------------------------------
# Tiling helper: largest multiple-of-8 divisor of n_rows whose tile fits the byte cap.
# ---------------------------------------------------------------------------
def _choose_tile_rows(n_rows, row_bytes, target_bytes):
    max_rows = max(8, target_bytes // max(int(row_bytes), 1))
    if n_rows <= max_rows:
        return n_rows
    for t in range(min(max_rows, n_rows), 7, -1):
        if n_rows % t == 0 and t % 8 == 0:
            return t
    # TODO(synk): pad ragged N to a multiple of 8 instead of falling back to one block.
    return n_rows


# ---------------------------------------------------------------------------
# Kernel 1: streaming batch mean/var (Welford/Chan combine) fused with the
#           running-stat update epilogue.
#   inputs : x tile (TILE_N, D), running_mean (1, D), running_var (1, D),
#            count (SMEM scalar)
#   outputs: new running_mean (1, D), new running_var (1, D)
#   scratch: mean_acc (1, D), m2_acc (1, D)
# ---------------------------------------------------------------------------
def _stats_update_kernel(x_ref, rm_ref, rv_ref, cnt_ref,
                         new_mean_ref, new_var_ref,
                         mean_acc, m2_acc, *, total_rows):
    step = pl.program_id(0)
    x = x_ref[...].astype(jnp.float32)                       # (TILE_N, D)
    tile_n = x.shape[0]

    tile_mean = jnp.sum(x, axis=0, keepdims=True) * (1.0 / tile_n)   # (1, D)
    diff = x - tile_mean
    tile_m2 = jnp.sum(diff * diff, axis=0, keepdims=True)             # (1, D)

    @pl.when(step == 0)
    def _():
        mean_acc[...] = tile_mean
        m2_acc[...] = tile_m2

    @pl.when(step > 0)
    def _():
        n_a = (step * tile_n).astype(jnp.float32)
        n_b = jnp.float32(tile_n)
        n_ab = n_a + n_b
        delta = tile_mean - mean_acc[...]
        mean_acc[...] = mean_acc[...] + delta * (n_b / n_ab)
        m2_acc[...] = m2_acc[...] + tile_m2 + delta * delta * (n_a * n_b / n_ab)

    @pl.when(step == pl.num_programs(0) - 1)
    def _():
        batch_mean = mean_acc[...]
        # torch.var defaults to unbiased (divide by N-1)
        batch_var = m2_acc[...] / jnp.float32(total_rows - 1)

        rm = rm_ref[...]
        rv = rv_ref[...]
        cnt = cnt_ref[0]
        bc = jnp.float32(total_rows)

        delta = batch_mean - rm
        tot = cnt + bc
        new_mean_ref[...] = rm + delta * (bc / tot)
        m2 = rv * cnt + batch_var * bc + delta * delta * (cnt * bc / tot)
        new_var_ref[...] = m2 / tot


def stats_and_running_update(x2d, running_mean, running_var, count, *, max_tile_bytes):
    n, d = x2d.shape
    itemsize = jnp.dtype(x2d.dtype).itemsize
    tile = _choose_tile_rows(n, d * itemsize, max_tile_bytes)
    grid = (n // tile,)

    kernel = functools.partial(_stats_update_kernel, total_rows=n)
    new_mean, new_var = pl.pallas_call(
        kernel,
        out_shape=(
            jax.ShapeDtypeStruct((1, d), jnp.float32),
            jax.ShapeDtypeStruct((1, d), jnp.float32),
        ),
        grid=grid,
        in_specs=[
            pl.BlockSpec((tile, d), lambda i: (i, 0)),
            pl.BlockSpec((1, d), lambda i: (0, 0)),
            pl.BlockSpec((1, d), lambda i: (0, 0)),
            pl.BlockSpec(memory_space=pltpu.MemorySpace.SMEM),
        ],
        out_specs=(
            pl.BlockSpec((1, d), lambda i: (0, 0)),
            pl.BlockSpec((1, d), lambda i: (0, 0)),
        ),
        scratch_shapes=[
            pltpu.VMEM((1, d), jnp.float32),
            pltpu.VMEM((1, d), jnp.float32),
        ],
        compiler_params=pltpu.CompilerParams(
            dimension_semantics=("arbitrary",),
        ),
    )(x2d, running_mean.reshape(1, d).astype(jnp.float32),
      running_var.reshape(1, d).astype(jnp.float32), count)
    return new_mean[0], new_var[0]


# ---------------------------------------------------------------------------
# Kernel 2: elementwise normalize / denormalize hot path (tiled over N).
# mean/var are (1, D') vectors (already lane-tiled when the lane-dense view is used);
# inv_std is computed once per (1, D') vector so the N x D loop is pure mul/add.
# ---------------------------------------------------------------------------
def _normalize_kernel(x_ref, mean_ref, var_ref, y_ref, *, eps, denorm, norm_only):
    x = x_ref[...].astype(jnp.float32)           # (TILE, D')
    mean = mean_ref[...]                         # (1, D') broadcasts over rows
    var = var_ref[...]
    if denorm:
        std = jnp.sqrt(var + eps)
        y = jnp.clip(x, -5.0, 5.0)
        y = std * y + mean
    elif norm_only:
        inv_std = 1.0 / jnp.sqrt(var + eps)      # (1, D') only — hot path is a multiply
        y = x * inv_std
    else:
        inv_std = 1.0 / jnp.sqrt(var + eps)
        y = (x - mean) * inv_std
        y = jnp.clip(y, -5.0, 5.0)
    y_ref[...] = y.astype(y_ref.dtype)


def apply_normalize(x2d, mean, var, *, eps, denorm, norm_only, max_tile_bytes):
    n, d = x2d.shape
    out_dtype = jnp.result_type(x2d.dtype, jnp.float32)
    # TODO(synk): for bf16 obs pipelines, writing y back in x2d.dtype halves write bytes.

    # Lane-dense repack: when D underfills the 128-lane vreg, view (N, D) as
    # (N/rep, 128) and tile mean/var across lanes so stores are full-width.
    if d < 128 and 128 % d == 0 and n % (128 // d) == 0:
        rep = 128 // d
        x_work = x2d.reshape(n // rep, 128)
        mean_w = jnp.tile(mean.reshape(1, d).astype(jnp.float32), (1, rep))
        var_w = jnp.tile(var.reshape(1, d).astype(jnp.float32), (1, rep))
    else:
        x_work = x2d
        mean_w = mean.reshape(1, d).astype(jnp.float32)
        var_w = var.reshape(1, d).astype(jnp.float32)

    rows, cols = x_work.shape
    itemsize = jnp.dtype(x_work.dtype).itemsize
    tile = _choose_tile_rows(rows, cols * itemsize, max_tile_bytes)
    grid = (rows // tile,)

    kernel = functools.partial(
        _normalize_kernel, eps=eps, denorm=denorm, norm_only=norm_only
    )
    y = pl.pallas_call(
        kernel,
        out_shape=jax.ShapeDtypeStruct((rows, cols), out_dtype),
        grid=grid,
        in_specs=[
            pl.BlockSpec((tile, cols), lambda i: (i, 0)),
            pl.BlockSpec((1, cols), lambda i: (0, 0)),
            pl.BlockSpec((1, cols), lambda i: (0, 0)),
        ],
        out_specs=pl.BlockSpec((tile, cols), lambda i: (i, 0)),
        compiler_params=pltpu.CompilerParams(
            dimension_semantics=("parallel",),
        ),
    )(x_work, mean_w, var_w)
    return y.reshape(n, d)


# ---------------------------------------------------------------------------
# Module wrapper (plain-JAX glue: view/reshape + buffer bookkeeping).
# ---------------------------------------------------------------------------
class RLRunningMeanStdPallas:
    def __init__(self, insize, epsilon=1e-5, per_channel=False, norm_only=False,
                 max_tile_bytes=2 << 20):
        assert not per_channel, "only per_channel=False (insize=int) path implemented"
        self.insize = int(insize)
        self.epsilon = float(epsilon)
        self.norm_only = norm_only
        self.max_tile_bytes = int(max_tile_bytes)
        # buffers (float32 stand-in for torch float64 buffers)
        self.running_mean = jnp.zeros((self.insize,), dtype=jnp.float32)
        self.running_var = jnp.ones((self.insize,), dtype=jnp.float32)
        self.count = jnp.ones((1,), dtype=jnp.float32)   # (1,) so it rides in SMEM
        self.training = True

    def __call__(self, x, denorm=False):
        tensor_size = x.shape
        x2d = x.reshape(-1, self.insize)   # native dtype; kernels cast to f32 inside

        if self.training:
            new_mean, new_var = stats_and_running_update(
                x2d, self.running_mean, self.running_var, self.count,
                max_tile_bytes=self.max_tile_bytes,
            )
            self.running_mean = new_mean
            self.running_var = new_var
            self.count = self.count + jnp.float32(x2d.shape[0])

        y = apply_normalize(
            x2d,
            self.running_mean,
            self.running_var,
            eps=self.epsilon,
            denorm=denorm,
            norm_only=self.norm_only,
            max_tile_bytes=self.max_tile_bytes,
        )
        return y.reshape(tensor_size)


# ---------------------------------------------------------------------------
# Pure-JAX reference (mirrors the torch forward, fresh buffers) for a sanity check.
# ---------------------------------------------------------------------------
def reference_forward(x, insize, eps=1e-5):
    x2d = x.reshape(-1, insize).astype(jnp.float32)
    n = x2d.shape[0]
    bm = jnp.mean(x2d, axis=0)
    bv = jnp.var(x2d, axis=0, ddof=1)
    rm = jnp.zeros((insize,), jnp.float32)
    rv = jnp.ones((insize,), jnp.float32)
    cnt = jnp.float32(1.0)
    delta = bm - rm
    tot = cnt + n
    new_mean = rm + delta * n / tot
    m2 = rv * cnt + bv * n + delta * delta * cnt * n / tot
    new_var = m2 / tot
    y = (x2d - new_mean) / jnp.sqrt(new_var + eps)
    y = jnp.clip(y, -5.0, 5.0)
    return y.reshape(x.shape), new_mean, new_var


if __name__ == "__main__":
    insize = 32
    key = jax.random.PRNGKey(0)
    # (batch=4, seq=64, features=32) -> view(-1, 32) == (256, 32)
    x = jax.random.normal(key, (4, 64, insize), dtype=jnp.float32) * 3.0 + 1.5

    # Small max_tile_bytes so the multi-tile (grid > 1) reduction and the tiled,
    # lane-dense normalize paths are exercised even at this small demo size.
    mod = RLRunningMeanStdPallas(insize, max_tile_bytes=8192)

    # training forward (running-stat update + normalize)
    y = jax.block_until_ready(mod(x))
    y_ref, rm_ref, rv_ref = reference_forward(x, insize)
    np.testing.assert_allclose(np.asarray(y), np.asarray(y_ref), rtol=1e-5, atol=1e-5)
    np.testing.assert_allclose(np.asarray(mod.running_mean), np.asarray(rm_ref),
                               rtol=1e-5, atol=1e-5)
    np.testing.assert_allclose(np.asarray(mod.running_var), np.asarray(rv_ref),
                               rtol=1e-5, atol=1e-5)

    # eval-mode denorm path
    mod.training = False
    y_dn = jax.block_until_ready(mod(x, denorm=True))
    x2d = x.reshape(-1, insize).astype(jnp.float32)
    dn_ref = (jnp.sqrt(mod.running_var + mod.epsilon) * jnp.clip(x2d, -5.0, 5.0)
              + mod.running_mean).reshape(x.shape)
    np.testing.assert_allclose(np.asarray(y_dn), np.asarray(dn_ref),
                               rtol=1e-5, atol=1e-5)

    print("KERNEL_OK")
</pallas_src>

<mosaic_0001>
module attributes {stable_mosaic.version = 11 : i64} {
  func.func @_stats_update_kernel(%arg0: i32, %arg1: memref<64x32xf32, #tpu.memory_space<vmem>>, %arg2: memref<1x32xf32, #tpu.memory_space<vmem>>, %arg3: memref<1x32xf32, #tpu.memory_space<vmem>>, %arg4: memref<1xf32, #tpu.memory_space<smem>>, %arg5: memref<1x32xf32, #tpu.memory_space<vmem>>, %arg6: memref<1x32xf32, #tpu.memory_space<vmem>>, %arg7: memref<1x32xf32, #tpu.memory_space<vmem>>, %arg8: memref<1x32xf32, #tpu.memory_space<vmem>>) attributes {dimension_semantics = [#tpu.dimension_semantics<arbitrary>], iteration_bounds = array<i64: 4>, scalar_prefetch = 0 : i64, scratch_operands = 2 : i64, tpu.core_type = #tpu.core_type<tc>, window_params = [{transform_indices = @transform_0, window_bounds = array<i64: 64, 32>}, {pipeline_mode = #tpu.pipeline_mode<synchronous>, transform_indices = @transform_1, window_bounds = array<i64: 1, 32>}, {pipeline_mode = #tpu.pipeline_mode<synchronous>, transform_indices = @transform_2, window_bounds = array<i64: 1, 32>}, {transform_indices = @transform_3, window_bounds = array<i64: 1>}, {pipeline_mode = #tpu.pipeline_mode<synchronous>, transform_indices = @transform_4, window_bounds = array<i64: 1, 32>}, {pipeline_mode = #tpu.pipeline_mode<synchronous>, transform_indices = @transform_5, window_bounds = array<i64: 1, 32>}]} {
    %c0 = arith.constant 0 : index
    %c0_0 = arith.constant 0 : index
    %0 = vector.load %arg1[%c0, %c0_0] : memref<64x32xf32, #tpu.memory_space<vmem>>, vector<64x32xf32>
    %cst = arith.constant dense<0.000000e+00> : vector<32xf32>
    %1 = vector.multi_reduction <add>, %0, %cst [0] : vector<64x32xf32> to vector<32xf32>
    %2 = vector.shape_cast %1 : vector<32xf32> to vector<1x32xf32>
    %cst_1 = arith.constant 1.562500e-02 : f32
    %3 = vector.broadcast %cst_1 : f32 to vector<1x32xf32>
    %4 = arith.mulf %2, %3 : vector<1x32xf32>
    %5 = vector.broadcast %4 : vector<1x32xf32> to vector<64x32xf32>
    %6 = arith.subf %0, %5 : vector<64x32xf32>
    %7 = arith.mulf %6, %6 : vector<64x32xf32>
    %cst_2 = arith.constant dense<0.000000e+00> : vector<32xf32>
    %8 = vector.multi_reduction <add>, %7, %cst_2 [0] : vector<64x32xf32> to vector<32xf32>
    %9 = vector.shape_cast %8 : vector<32xf32> to vector<1x32xf32>
    %c0_i32 = arith.constant 0 : i32
    %10 = arith.cmpi eq, %arg0, %c0_i32 : i32
    %11 = arith.extui %10 : i1 to i32
    %c0_i32_3 = arith.constant 0 : i32
    %12 = arith.cmpi ne, %11, %c0_i32_3 : i32
    scf.if %12 {
      %c0_7 = arith.constant 0 : index
      %c0_8 = arith.constant 0 : index
      %19 = vector.load %arg7[%c0_7, %c0_8] : memref<1x32xf32, #tpu.memory_space<vmem>>, vector<1x32xf32>
      tpu.vector_store %arg7[%c0_7, %c0_8], %4 {strides = array<i32>} : memref<1x32xf32, #tpu.memory_space<vmem>>, vector<1x32xf32>,
      %c0_9 = arith.constant 0 : index
      %c0_10 = arith.constant 0 : index
      %20 = vector.load %arg8[%c0_9, %c0_10] : memref<1x32xf32, #tpu.memory_space<vmem>>, vector<1x32xf32>
      tpu.vector_store %arg8[%c0_9, %c0_10], %9 {strides = array<i32>} : memref<1x32xf32, #tpu.memory_space<vmem>>, vector<1x32xf32>,
    } else {
    }
    %c0_i32_4 = arith.constant 0 : i32
    %13 = arith.cmpi sgt, %arg0, %c0_i32_4 : i32
    %14 = arith.extui %13 : i1 to i32
    %c0_i32_5 = arith.constant 0 : i32
    %15 = arith.cmpi ne, %14, %c0_i32_5 : i32
    scf.if %15 {
      %c64_i32 = arith.constant 64 : i32
      %19 = arith.muli %arg0, %c64_i32 : i32
      %20 = arith.sitofp %19 : i32 to f32
      %cst_7 = arith.constant 6.400000e+01 : f32
      %21 = arith.addf %20, %cst_7 : f32
      %c0_8 = arith.constant 0 : index
      %c0_9 = arith.constant 0 : index
      %22 = vector.load %arg7[%c0_8, %c0_9] : memref<1x32xf32, #tpu.memory_space<vmem>>, vector<1x32xf32>
      %23 = arith.subf %4, %22 : vector<1x32xf32>
      %c0_10 = arith.constant 0 : index
      %c0_11 = arith.constant 0 : index
      %24 = vector.load %arg7[%c0_10, %c0_11] : memref<1x32xf32, #tpu.memory_space<vmem>>, vector<1x32xf32>
      %cst_12 = arith.constant 6.400000e+01 : f32
      %25 = arith.divf %cst_12, %21 : f32
      %26 = vector.broadcast %25 : f32 to vector<1x32xf32>
      %27 = arith.mulf %23, %26 : vector<1x32xf32>
      %28 = arith.addf %24, %27 : vector<1x32xf32>
      %c0_13 = arith.constant 0 : index
      %c0_14 = arith.constant 0 : index
      %29 = vector.load %arg7[%c0_13, %c0_14] : memref<1x32xf32, #tpu.memory_space<vmem>>, vector<1x32xf32>
      tpu.vector_store %arg7[%c0_13, %c0_14], %28 {strides = array<i32>} : memref<1x32xf32, #tpu.memory_space<vmem>>, vector<1x32xf32>,
      %c0_15 = arith.constant 0 : index
      %c0_16 = arith.constant 0 : index
      %30 = vector.load %arg8[%c0_15, %c0_16] : memref<1x32xf32, #tpu.memory_space<vmem>>, vector<1x32xf32>
      %31 = arith.addf %30, %9 : vector<1x32xf32>
      %32 = arith.mulf %23, %23 : vector<1x32xf32>
      %cst_17 = arith.constant 6.400000e+01 : f32
      %33 = arith.mulf %20, %cst_17 : f32
      %34 = arith.divf %33, %21 : f32
      %35 = vector.broadcast %34 : f32 to vector<1x32xf32>
      %36 = arith.mulf %32, %35 : vector<1x32xf32>
      %37 = arith.addf %31, %36 : vector<1x32xf32>
      %c0_18 = arith.constant 0 : index
      %c0_19 = arith.constant 0 : index
      %38 = vector.load %arg8[%c0_18, %c0_19] : memref<1x32xf32, #tpu.memory_space<vmem>>, vector<1x32xf32>
      tpu.vector_store %arg8[%c0_18, %c0_19], %37 {strides = array<i32>} : memref<1x32xf32, #tpu.memory_space<vmem>>, vector<1x32xf32>,
    } else {
    }
    %c3_i32 = arith.constant 3 : i32
    %16 = arith.cmpi eq, %arg0, %c3_i32 : i32
    %17 = arith.extui %16 : i1 to i32
    %c0_i32_6 = arith.constant 0 : i32
    %18 = arith.cmpi ne, %17, %c0_i32_6 : i32
    scf.if %18 {
      %c0_7 = arith.constant 0 : index
      %c0_8 = arith.constant 0 : index
      %19 = vector.load %arg7[%c0_7, %c0_8] : memref<1x32xf32, #tpu.memory_space<vmem>>, vector<1x32xf32>
      %c0_9 = arith.constant 0 : index
      %c0_10 = arith.constant 0 : index
      %20 = vector.load %arg8[%c0_9, %c0_10] : memref<1x32xf32, #tpu.memory_space<vmem>>, vector<1x32xf32>
      %cst_11 = arith.constant 2.550000e+02 : f32
      %21 = vector.broadcast %cst_11 : f32 to vector<1x32xf32>
      %22 = arith.divf %20, %21 : vector<1x32xf32>
      %c0_12 = arith.constant 0 : index
      %c0_13 = arith.constant 0 : index
      %23 = vector.load %arg2[%c0_12, %c0_13] : memref<1x32xf32, #tpu.memory_space<vmem>>, vector<1x32xf32>
      %c0_14 = arith.constant 0 : index
      %c0_15 = arith.constant 0 : index
      %24 = vector.load %arg3[%c0_14, %c0_15] : memref<1x32xf32, #tpu.memory_space<vmem>>, vector<1x32xf32>
      %c0_16 = arith.constant 0 : index
      %25 = memref.load %arg4[%c0_16] : memref<1xf32, #tpu.memory_space<smem>>
      %26 = arith.subf %19, %23 : vector<1x32xf32>
      %cst_17 = arith.constant 2.560000e+02 : f32
      %27 = arith.addf %25, %cst_17 : f32
      %cst_18 = arith.constant 2.560000e+02 : f32
      %28 = arith.divf %cst_18, %27 : f32
      %29 = vector.broadcast %28 : f32 to vector<1x32xf32>
      %30 = arith.mulf %26, %29 : vector<1x32xf32>
      %31 = arith.addf %23, %30 : vector<1x32xf32>
      %c0_19 = arith.constant 0 : index
      %c0_20 = arith.constant 0 : index
      %32 = vector.load %arg5[%c0_19, %c0_20] : memref<1x32xf32, #tpu.memory_space<vmem>>, vector<1x32xf32>
      tpu.vector_store %arg5[%c0_19, %c0_20], %31 {strides = array<i32>} : memref<1x32xf32, #tpu.memory_space<vmem>>, vector<1x32xf32>,
      %33 = vector.broadcast %25 : f32 to vector<1x32xf32>
      %34 = arith.mulf %24, %33 : vector<1x32xf32>
      %cst_21 = arith.constant 2.560000e+02 : f32
      %35 = vector.broadcast %cst_21 : f32 to vector<1x32xf32>
      %36 = arith.mulf %22, %35 : vector<1x32xf32>
      %37 = arith.addf %34, %36 : vector<1x32xf32>
      %38 = arith.mulf %26, %26 : vector<1x32xf32>
      %cst_22 = arith.constant 2.560000e+02 : f32
      %39 = arith.mulf %25, %cst_22 : f32
      %40 = arith.divf %39, %27 : f32
      %41 = vector.broadcast %40 : f32 to vector<1x32xf32>
      %42 = arith.mulf %38, %41 : vector<1x32xf32>
      %43 = arith.addf %37, %42 : vector<1x32xf32>
      %44 = vector.broadcast %27 : f32 to vector<1x32xf32>
      %45 = arith.divf %43, %44 : vector<1x32xf32>
      %c0_23 = arith.constant 0 : index
      %c0_24 = arith.constant 0 : index
      %46 = vector.load %arg6[%c0_23, %c0_24] : memref<1x32xf32, #tpu.memory_space<vmem>>, vector<1x32xf32>
      tpu.vector_store %arg6[%c0_23, %c0_24], %45 {strides = array<i32>} : memref<1x32xf32, #tpu.memory_space<vmem>>, vector<1x32xf32>,
    } else {
    }
    return
  }
  func.func @transform_0(%arg0: i32) -> (i32, i32) {
    %c0_i32 = arith.constant 0 : i32
    %c0_i32_0 = arith.constant 0 : i32
    return %arg0, %c0_i32 : i32, i32
  }
  func.func @transform_1(%arg0: i32) -> (i32, i32) {
    %c0_i32 = arith.constant 0 : i32
    %c0_i32_0 = arith.constant 0 : i32
    %c0_i32_1 = arith.constant 0 : i32
    return %c0_i32, %c0_i32_0 : i32, i32
  }
  func.func @transform_2(%arg0: i32) -> (i32, i32) {
    %c0_i32 = arith.constant 0 : i32
    %c0_i32_0 = arith.constant 0 : i32
    %c0_i32_1 = arith.constant 0 : i32
    return %c0_i32, %c0_i32_0 : i32, i32
  }
  func.func @transform_3(%arg0: i32) -> i32 {
    %c0_i32 = arith.constant 0 : i32
    %c0_i32_0 = arith.constant 0 : i32
    return %c0_i32 : i32
  }
  func.func @transform_4(%arg0: i32) -> (i32, i32) {
    %c0_i32 = arith.constant 0 : i32
    %c0_i32_0 = arith.constant 0 : i32
    %c0_i32_1 = arith.constant 0 : i32
    return %c0_i32, %c0_i32_0 : i32, i32
  }
  func.func @transform_5(%arg0: i32) -> (i32, i32) {
    %c0_i32 = arith.constant 0 : i32
    %c0_i32_0 = arith.constant 0 : i32
    %c0_i32_1 = arith.constant 0 : i32
    return %c0_i32, %c0_i32_0 : i32, i32
  }
}

</mosaic_0001>

<bundles_post_ra>
// kernel: tpu_custom_call.1
= control target key start
LH: loop header
LB: loop body
LE: loop exit
PB: predicated region body
PF: predicated region fallthrough
CT: control target
= control target key end

     0   :  { %s662_s0 = inlined_call_operand.vmem [shape: f32[256,32], index: 0, kind: input, shape index: {}]   ;;  %s663_s1 = inlined_call_operand.vmem [shape: f32[1,32], index: 1, kind: input, shape index: {}]   ;;  %s664_s2 = inlined_call_operand.vmem [shape: f32[1,32], index: 2, kind: input, shape index: {}]   ;;  %s665_s3 = inlined_call_operand.<no memory space> [shape: f32[1], index: 3, kind: input, shape index: {}]   ;;  %s666_s4 = inlined_call_operand.hbm [shape: f32[1,32], index: 4, kind: output, shape index: {0}]   ;;  %s667_s5 = inlined_call_operand.hbm [shape: f32[1,32], index: 5, kind: output, shape index: {1}]  }
   0x1   :  { %11 = sst [smem:[#allocation4]] %s665_s3 }
   0x2   :  { %12 = vsyncpa [#allocation6], 0 }
   0x3   :  { %13 = vsyncpa [#allocation8], 0  ;;  %s574_s20 = smov 0  }
   0x4 LB: > { %s580_s21 = sadd.s32 4294967295, %s537_s20   ;;  %p428_p0 = scmp.ge.s32.totalorder %s537_s20, 1  ;;  %s537_s20 = sphi %s574_s20, %s19_s20  }
   0x5   : > { %p184_p1 = scmp.lt.s32.totalorder %s537_s20, 5 }
   0x7   : > { %p185_p2 = pnand %p428_p0, %p184_p1 }
   0x8   : > { %s429_s3 = sshll.u32 (!%p185_p2), %s580_s21, 3  ;;  %vm221_vm0 = vcmask (!%p185_p2), 261120   ;;  %p431_p4 = scmp.ne.s32.totalorder (!%p185_p2), %s580_s21, 0 }
   0x9   : > { %188 = sbr.rel (%p185_p2) target bundleno = 288 (0x120), region = 36  ;;  %p208_p3 = scmp.lt.s32.totalorder (!%p185_p2), %s429_s3, 31 }
  0x10   : > { %s669_s3 = smov (!%p208_p3, %s429_s3), 31  ;;  %vm285_vm1 = vcmask (!%p431_p4), 253952  }
  0x11   : > { %s430_s22 = sshll.u32 %s669_s3, 3 }
  0x12   : > { %s211_s25 = scalar_lea.vmem %s662_s0, %s430_s22 }
  0x13   : > { %v213_v0 = vld [vmem:[%s211_s25] sm:$0xff]  ;;  %v214_v1 = vld [vmem:[%s211_s25 + $0x8] sm:$0xff]  ;;  %v215_v2 = vld [vmem:[%s211_s25 + $0x10] sm:$0xff] }
  0x14   : > { %v216_v3 = vld [vmem:[%s211_s25 + $0x18] sm:$0xff]  ;;  %v222_v4 = vsel %vm221_vm0, %v213_v0, 0.0  ;;  %v223_v5 = vsel %vm221_vm0, %v214_v1, 0.0  ;;  %v225_v6 = vsel %vm221_vm0, %v215_v2, 0.0  ;;  %v217_v7 = vld [vmem:[%s211_s25 + $0x20] sm:$0xff]  ;;  %v218_v10 = vld [vmem:[%s211_s25 + $0x28] sm:$0xff] }
  0x15   : > { %v224_v8 = vadd.f32 %v223_v5, %v222_v4  ;;  %v227_v9 = vsel %vm221_vm0, %v216_v3, 0.0  ;;  %v229_v12 = vsel %vm221_vm0, %v217_v7, 0.0  ;;  %v219_v13 = vld [vmem:[%s211_s25 + $0x30] sm:$0xff]  ;;  %v231_v15 = vsel %vm221_vm0, %v218_v10, 0.0  ;;  %v220_v16 = vld [vmem:[%s211_s25 + $0x38] sm:$0xff] }
  0x16   : > { %v233_v18 = vsel %vm221_vm0, %v219_v13, 0.0  ;;  %v235_v20 = vsel %vm221_vm0, %v220_v16, 0.0 }
  0x17   : > { %v226_v11 = vadd.f32 %v225_v6, %v224_v8 }
  0x19   : > { %v228_v14 = vadd.f32 %v227_v9, %v226_v11 }
  0x1b   : > { %v230_v17 = vadd.f32 %v229_v12, %v228_v14 }
  0x1d   : > { %v232_v19 = vadd.f32 %v231_v15, %v230_v17 }
  0x1f   : > { %v234_v21 = vadd.f32 %v233_v18, %v232_v19 }
  0x21   : > { %v236_v22 = vadd.f32 %v235_v20, %v234_v21 }
  0x23   : > { %v237_v23 = vrot.slane %v236_v22, 4 }
  0x25   : > { %v238_v24 = vadd.f32 %v237_v23, %v236_v22 }
  0x27   : > { %v239_v25 = vrot.slane %v238_v24, 2 }
  0x29   : > { %v240_v26 = vadd.f32 %v239_v25, %v238_v24 }
  0x2b   : > { %v241_v27 = vrot.slane %v240_v26, 1 }
  0x2d   : > { %v242_v28 = vadd.f32 %v241_v27, %v240_v26 }
  0x2f   : > { %v243_v29 = vmul.f32 0.015625, %v242_v28 }
  0x31   : > { %v244_v30 = vsub.f32 %v213_v0, %v243_v29  ;;  %v245_v31 = vsub.f32 %v214_v1, %v243_v29  ;;  %v246_v32 = vsub.f32 %v215_v2, %v243_v29  ;;  %v247_v33 = vsub.f32 %v216_v3, %v243_v29  ;;  %286 = vst.msk [vmem:[#allocation2] sm:$0x1] (!%p431_p4), %vm285_vm1, %v243_v29 }
  0x32   : > { %v248_v34 = vsub.f32 %v217_v7, %v243_v29  ;;  %v249_v35 = vsub.f32 %v218_v10, %v243_v29  ;;  %v250_v40 = vsub.f32 %v219_v13, %v243_v29  ;;  %v251_v46 = vsub.f32 %v220_v16, %v243_v29 }
  0x33   : > { %v252_v36 = vmul.f32 %v244_v30, %v244_v30  ;;  %v253_v37 = vmul.f32 %v245_v31, %v245_v31  ;;  %v254_v38 = vmul.f32 %v246_v32, %v246_v32  ;;  %v255_v39 = vmul.f32 %v247_v33, %v247_v33 }
  0x34   : > { %v256_v41 = vmul.f32 %v248_v34, %v248_v34  ;;  %v257_v47 = vmul.f32 %v249_v35, %v249_v35  ;;  %v258_v50 = vmul.f32 %v250_v40, %v250_v40  ;;  %v259_v53 = vmul.f32 %v251_v46, %v251_v46 }
  0x35   : > { %v260_v42 = vsel %vm221_vm0, %v252_v36, 0.0  ;;  %v261_v43 = vsel %vm221_vm0, %v253_v37, 0.0  ;;  %v263_v44 = vsel %vm221_vm0, %v254_v38, 0.0  ;;  %v265_v48 = vsel %vm221_vm0, %v255_v39, 0.0 }
  0x36   : > { %v262_v45 = vadd.f32 %v261_v43, %v260_v42  ;;  %v267_v51 = vsel %vm221_vm0, %v256_v41, 0.0  ;;  %v269_v54 = vsel %vm221_vm0, %v257_v47, 0.0  ;;  %v271_v56 = vsel %vm221_vm0, %v258_v50, 0.0 }
  0x37   : > { %v273_v58 = vsel %vm221_vm0, %v259_v53, 0.0 }
  0x38   : > { %v264_v49 = vadd.f32 %v263_v44, %v262_v45 }
  0x3a   : > { %v266_v52 = vadd.f32 %v265_v48, %v264_v49 }
  0x3c   : > { %v268_v55 = vadd.f32 %v267_v51, %v266_v52 }
  0x3e   : > { %v270_v57 = vadd.f32 %v269_v54, %v268_v55 }
  0x40   : > { %v272_v59 = vadd.f32 %v271_v56, %v270_v57 }
  0x42   : > { %v274_v60 = vadd.f32 %v273_v58, %v272_v59 }
  0x44   : > { %v275_v61 = vrot.slane %v274_v60, 4 }
  0x46   : > { %v276_v62 = vadd.f32 %v275_v61, %v274_v60 }
  0x48   : > { %v277_v63 = vrot.slane %v276_v62, 2  ;;  %284 = sbr.rel (%p431_p4) target bundleno = 81 (0x51), region = 40 }
  0x4a   : > { %v278_v0 = vadd.f32 %v277_v63, %v276_v62 }
  0x4c   : > { %v279_v1 = vrot.slane %v278_v0, 1 }
  0x4e   : > { %v280_v2 = vadd.f32 %v279_v1, %v278_v0 }
  0x50   : > { %287 = vst.msk [vmem:[#allocation3] sm:$0x1] %vm285_vm1, %v280_v2 }
  0x51 PF: > { %p432_p5 = scmp.le.s32.totalorder %s580_s21, 0 }
  0x52   : > { %s433_s26 = sshll.u32 (!%p432_p5), %s580_s21, 6  ;;  %v295_v5 = vld [vmem:[#allocation2] sm:$0x1] (!%p432_p5)  ;;  %vm304_vm2 = vcmask (!%p432_p5), 253952  }
  0x53   : > { %291 = sbr.rel (%p432_p5) target bundleno = 158 (0x9e), region = 44  ;;  %s293_s27 = scvt.s32.f32 (!%p432_p5), %s433_s26  ;;  %v296_v6 = vsub.f32 (!%p432_p5), %v243_v29, %v295_v5 }
  0x55   : > { %s294_s28 = sadd.f32 (!%p432_p5), 64.0, %s293_s27  ;;  %s309_s29 = smul.f32 (!%p432_p5), 64.0, %s293_s27  ;;  %v308_v8 = vmul.f32 (!%p432_p5), %v296_v6, %v296_v6 }
  0x57   : > { %v297_v3 = vstv (!%p432_p5), %s294_s28  ;;  %v306_v7 = vld [vmem:[#allocation3] sm:$0x1] (!%p432_p5) }
  0x58   : > { %467 = vrcp.f32 (!%p432_p5), %v297_v3  ;;  %v307_v10 = vadd.f32 (!%p432_p5), %v306_v7, %v280_v2 }
  0x62   : > { %v468_v4 = vpop.eup %467 }
  0x63   : > { %441 = vpush %v468_v4 }
  0x94   : > { %s442_s30 = spop %441 }
  0x95   : > { %s300_s6 = smul.f32 64.0, %s442_s30 }
  0x96   : > { %s313_s7 = smul.f32 %s442_s30, %s309_s29 }
  0x97   : > { %v301_v9 = vstv %s300_s6 }
  0x98   : > { %v302_v11 = vmul.f32 %v301_v9, %v296_v6  ;;  %v314_v12 = vstv %s313_s7 }
  0x99   : > { %v315_v13 = vmul.f32 %v314_v12, %v308_v8 }
  0x9a   : > { %v303_v14 = vadd.f32 %v302_v11, %v295_v5 }
  0x9b   : > { %v316_v15 = vadd.f32 %v315_v13, %v307_v10 }
  0x9c   : > { %305 = vst.msk [vmem:[#allocation2] sm:$0x1] %vm304_vm2, %v303_v14 }
  0x9d   : > { %317 = vst.msk [vmem:[#allocation3] sm:$0x1] %vm304_vm2, %v316_v15 }
  0x9e PF: > { %p434_p6 = scmp.ne.s32.totalorder %s580_s21, 3 }
  0x9f   : > { %s328_s8 = sld [smem:[#allocation4]] (!%p434_p6)  ;;  %v326_v20 = vld [vmem:[%s663_s1] sm:$0x1] (!%p434_p6)  ;;  %vm338_vm3 = vcmask (!%p434_p6), 253952  }
  0xa0   : > { %321 = sbr.rel (%p434_p6) target bundleno = 240 (0xf0), region = 48  ;;  %v327_v22 = vld [vmem:[%s664_s2] sm:$0x1] (!%p434_p6) }
  0xa3   : > { %v322_v19 = vld [vmem:[#allocation2] sm:$0x1] (!%p434_p6) }
  0xa4   : > { %v323_v18 = vld [vmem:[#allocation3] sm:$0x1] (!%p434_p6)  ;;  %v329_v24 = vsub.f32 (!%p434_p6), %v322_v19, %v326_v20 }
  0xa5   : > { %s330_s9 = sadd.f32 (!%p434_p6), 256.0, %s328_s8  ;;  %v325_v21 = vmul.f32 (!%p434_p6), 0.003921569, %v323_v18  ;;  %v340_v23 = vstv (!%p434_p6), %s328_s8  ;;  %s345_s14 = smul.f32 (!%p434_p6), 256.0, %s328_s8 }
  0xa6   : > { %v341_v25 = vmul.f32 (!%p434_p6), %v340_v23, %v327_v22  ;;  %v344_v27 = vmul.f32 (!%p434_p6), %v329_v24, %v329_v24 }
  0xa7   : > { %v331_v16 = vstv %s330_s9  ;;  %v342_v26 = vmul.f32 256.0, %v325_v21 }
  0xa8   : > { %469 = vrcp.f32 %v331_v16 }
  0xa9   : > { %v343_v29 = vadd.f32 %v342_v26, %v341_v25 }
  0xb2   : > { %v470_v17 = vpop.eup %469 }
  0xb3   : > { %443 = vpush %v470_v17 }
  0xe4   : > { %s444_s15 = spop %443 }
  0xe5   : > { %s334_s16 = smul.f32 256.0, %s444_s15 }
  0xe6   : > { %s349_s17 = smul.f32 %s444_s15, %s345_s14 }
  0xe7   : > { %v335_v28 = vstv %s334_s16 }
  0xe8   : > { %v336_v30 = vmul.f32 %v335_v28, %v329_v24  ;;  %v350_v31 = vstv %s349_s17 }
  0xe9   : > { %v351_v32 = vmul.f32 %v350_v31, %v344_v27 }
  0xea   : > { %v337_v33 = vadd.f32 %v336_v30, %v326_v20 }
  0xeb   : > { %v352_v34 = vadd.f32 %v351_v32, %v343_v29 }
  0xec   : > { %339 = vst.msk [vmem:[#allocation5] sm:$0x1] %vm338_vm3, %v337_v33 }
  0xed   : > { %v355_v35 = vmul.f32 %v470_v17, %v352_v34 }
  0xef   : > { %356 = vst.msk [vmem:[#allocation7] sm:$0x1] %vm338_vm3, %v355_v35 }
  0xf0 PF: > { %p453_p7 = scmp.eq.s32.totalorder %s580_s21, 3  ;;  %s539_s18 = smov [#allocation5]  }
  0xf1   : > { %s364_s19 = sshll.u32 %s539_s18, 4  ;;  %s540_s3 = smov [#allocation7]   ;;  %s365_s19 = int_to_ptr.vmem [resolvable:$true] %s364_s19 }
  0xf2   : > { %s375_s22 = sshll.u32 %s540_s3, 4  ;;  %s471_s23 = scalar_lea.vmem %s365_s19, 16  ;;  %s376_s22 = int_to_ptr.vmem [resolvable:$true] %s375_s22 }
  0xf3   : > { %p472_p8 = scmp.ne.s32.totalorder %s365_s19, %s471_s23  ;;  %s477_s24 = scalar_lea.vmem %s365_s19, 32 }
  0xf4   : > { %p478_p11 = scmp.lt.s32.totalorder %s365_s19, %s365_s19  ;;  %p479_p12 = scmp.lt.s32.totalorder %s477_s24, %s471_s23 }
  0xf5   : > { %p473_p9 = pnand %p472_p8, %p453_p7 }
  0xf6   : > { %p480_p13 = por %p479_p12, %p478_p11 }
  0xf7   : > { %p474_p10 = pneg %p473_p9 }
  0xf9   : > { %p481_p0 = pnand %p480_p13, %p474_p10 }
  0xfb   : > { %484 = shalt.err (!%p481_p0)
}
  0xfc   : > { %s485_s27 = scalar_lea.hbm %s666_s4, 16 }
  0xfd   : > { %p486_p1 = scmp.ne.s32.totalorder %s666_s4, %s485_s27  ;;  %p491_p4 = scmp.lt.u32.totalorder %s485_s27, %s666_s4 }
  0xff   : > { %p487_p2 = pnand %p486_p1, %p453_p7 }
 0x101   : > { %p488_p3 = pneg %p487_p2 }
 0x103   : > { %p493_p5 = pnand %p491_p4, %p488_p3 }
 0x105   : > { %496 = shalt.err (!%p493_p5)
}
 0x106   : > { %446 = dma.vmem_to_hbm [thread:$0]  (%p453_p7), %s365_s19, 16, %s666_s4, [#allocation6]  }
 0x107   : > { %s497_s9 = scalar_lea.vmem %s376_s22, 16  ;;  %s503_s10 = scalar_lea.vmem %s376_s22, 32 }
 0x108   : > { %p498_p6 = scmp.ne.s32.totalorder %s376_s22, %s497_s9  ;;  %p504_p10 = scmp.lt.s32.totalorder %s376_s22, %s376_s22 }
 0x109   : > { %p505_p11 = scmp.lt.s32.totalorder %s503_s10, %s497_s9 }
 0x10a   : > { %p499_p8 = pnand %p498_p6, %p453_p7 }
 0x10b   : > { %p506_p12 = por %p505_p11, %p504_p10 }
 0x10c   : > { %p500_p9 = pneg %p499_p8 }
 0x10e   : > { %p507_p13 = pnand %p506_p12, %p500_p9 }
 0x110   : > { %510 = shalt.err (!%p507_p13)
}
 0x111   : > { %s511_s13 = scalar_lea.hbm %s667_s5, 16 }
 0x112   : > { %p512_p0 = scmp.ne.s32.totalorder %s667_s5, %s511_s13  ;;  %p517_p3 = scmp.lt.u32.totalorder %s511_s13, %s667_s5 }
 0x114   : > { %p513_p1 = pnand %p512_p0, %p453_p7 }
 0x116   : > { %p514_p2 = pneg %p513_p1 }
 0x118   : > { %p519_p4 = pnand %p517_p3, %p514_p2 }
 0x11a   : > { %522 = shalt.err (!%p519_p4)
}
 0x11b   : > { %448 = dma.vmem_to_hbm [thread:$0]  (%p453_p7), %s376_s22, 16, %s667_s5, [#allocation8]  }
 0x11c   : > { %528 = dma.done.wait (%p453_p7), [#allocation6], 16  }
 0x11d   : > { %530 = vsyncadd (%p453_p7), [#allocation6], 4294967280 }
 0x11e   : > { %532 = dma.done.wait (%p453_p7), [#allocation8], 16  }
 0x11f   : > { %534 = vsyncadd (%p453_p7), [#allocation8], 4294967280 }
 0x120 PF: > { %s19_s20 = sadd.s32 1, %s537_s20  }
 0x121   : > { %p16_p5 = scmp.ge.s32.totalorder %s19_s20, 6  }
 0x123   :  { %18 = sbr.rel (!%p16_p5) target bundleno = 4 (0x4), region = 83 }
 0x12a   :  { %392 = vsyncpa [#allocation6], 1 }
 0x12b   :  { %394 = vsyncpa [#allocation6 + $0x1], 1 }
 0x12c   :  { %395 = vsyncpa [#allocation8], 1 }

</bundles_post_ra>
